<compile_context>
chip_gen: v7x
topology: tpu7x:2x2x1
jax: 0.10.0
libtpu: 0.0.40
codegen_flags: <defaults>
</compile_context>

<pallas_src>
import functools

import jax
import jax.numpy as jnp
import numpy as np
from jax import lax
from jax.experimental import pallas as pl
from jax.experimental.pallas import tpu as pltpu


# ---------------------------------------------------------------------------
# Pallas kernel: one grid step per (delay tap k, BC tile j).
#   x_ref   : (block_bc, HW)   -- X[k, tile_j, :]
#   buf_ref : (block_bc, HW)   -- ring_buffer[eff_idx[k], tile_j, :]
#   out_ref : (block_bc, HW)   -- X_new[k, tile_j, :]  (same HBM buffer as X)
# ---------------------------------------------------------------------------
def _trace_kernel(eff_idx_ref, x_ref, buf_ref, out_ref, *, decay):
    del eff_idx_ref  # consumed by the index_maps (scalar prefetch)
    out_ref[...] = decay * x_ref[...] + buf_ref[...]


def _vmem_capacity_bytes():
    """Generation-aware VMEM capacity (128 MiB v5e/v6e, 64 MiB v7x)."""
    try:
        return int(pltpu.get_tpu_info().vmem_capacity_bytes)
    except Exception:
        return 64 * 1024 * 1024  # conservative fallback (v7x-sized)


def _pick_bc_block(bc, hw, itemsize, vmem_cap):
    """Per-grid-step BC tile size.

    * dtype-aware sublane alignment (8 for f32, 16 for bf16, 32 for int8);
    * per-ref block budget scales with the chip's VMEM (~8 MiB/ref on 128 MiB
      parts, ~4 MiB on v7x's 64 MiB; never below 2 MiB) so that
      3 refs x 2 pipeline buffers double-buffer comfortably;
    * never silently falls back to the full BC: if no aligned exact divisor
      fits the budget, return the aligned cap and let the caller use a
      pl.cdiv grid (ragged last tile, masked writes).
    """
    sub = max(1, 32 // itemsize)
    target = max(2 * 1024 * 1024, vmem_cap // 16)
    row_bytes = max(1, hw * itemsize)
    cap = max(sub, (target // row_bytes) // sub * sub)
    if bc <= cap:
        return bc
    for d in range(cap, sub - 1, -sub):          # largest aligned exact divisor
        if bc % d == 0:
            return d
    return cap                                   # ragged last tile


def init_state(batch, C, m, T, H, W, dtype=jnp.float32):
    """Kernel-layout state: lane-dense trace, ring buffer, write pointer.

    Lane (last) dim is H*W. If H*W were < 128 (or not a multiple of 128) in a
    real workload, fold C into the lane dim here to keep output stores unmasked.
    """
    BC, HW = batch * C, H * W
    X = jnp.zeros((m, BC, HW), dtype)        # postsynaptic trace, (M, B*C, H*W)
    buf = jnp.zeros((T, BC, HW), dtype)      # input ring buffer, (T, B*C, H*W)
    ptr = jnp.asarray(0, dtype=jnp.int32)    # slot holding the most recent input
    return X, buf, ptr


def no_dyn_feed_forward_step(input_tensor, state, delay_idx, *, decay):
    """One step of the noDyn feed-forward cell.

    input_tensor: (B, C, H, W)    current spike input
    state:        (X, buffer, ptr) in kernel layout (see init_state)
    delay_idx:    (M,) int32      delay (in timesteps) per tap
    """
    X, buf, ptr = state
    M, BC, HW = X.shape
    T = buf.shape[0]

    # Ring buffer: write exactly ONE slab per step. With the state donated at
    # the jit boundary (or carried through lax.scan) XLA does this in place --
    # no hidden full (T, BC, HW) copy through HBM.
    inp3 = input_tensor.reshape(1, BC, HW).astype(buf.dtype)
    new_ptr = (ptr + 1) % T
    new_buf = lax.dynamic_update_slice(buf, inp3, (new_ptr, 0, 0))
    # effective slot of "delay_idx[k] steps ago"; mod T also range-protects.
    eff_idx = ((new_ptr - delay_idx) % T).astype(jnp.int32)

    vmem_cap = _vmem_capacity_bytes()
    block_bc = _pick_bc_block(BC, HW, X.dtype.itemsize, vmem_cap)
    n_bc = pl.cdiv(BC, block_bc)
    decay_c = X.dtype.type(decay)            # keep the multiply in the state dtype

    grid_spec = pltpu.PrefetchScalarGridSpec(
        num_scalar_prefetch=1,
        # Tap axis outer ("arbitrary"), BC-tile axis inner ("parallel"):
        # consecutive steps stream contiguous tiles of one X[k]/buf[eff[k]]
        # plane, and v7x megacore sharding never splits the odd tap axis.
        grid=(M, n_bc),
        in_specs=[
            # trace slice for tap k, BC tile j (lane dim = HW -> unmasked stores)
            pl.BlockSpec((None, block_bc, HW), lambda k, j, eff: (k, j, 0)),
            # delayed input: gather ring_buffer[eff_idx[k]] via prefetched table
            pl.BlockSpec((None, block_bc, HW), lambda k, j, eff: (eff[k], j, 0)),
        ],
        out_specs=pl.BlockSpec((None, block_bc, HW), lambda k, j, eff: (k, j, 0)),
    )

    X_new = pl.pallas_call(
        functools.partial(_trace_kernel, decay=decay_c),
        out_shape=jax.ShapeDtypeStruct(X.shape, X.dtype),
        grid_spec=grid_spec,
        # operand order: (eff_idx, X, new_buf) -> alias X (index 1, counting the
        # scalar-prefetch arg) onto the X_new output: fully in-place trace update.
        input_output_aliases={1: 0},
        compiler_params=pltpu.CompilerParams(
            dimension_semantics=("arbitrary", "parallel"),
            vmem_limit_bytes=min(vmem_cap * 3 // 4, 96 * 1024 * 1024),
        ),
    )(eff_idx, X, new_buf)

    z = input_tensor  # no internal dynamics: spikes pass straight through
    return z, (X_new, new_buf, new_ptr)


def no_dyn_feed_forward_run(inputs, state, delay_idx, *, decay):
    """Batch timesteps under lax.scan: one dispatch for the whole sequence,
    state stays on device and is updated in place when donated."""
    def body(carry, inp):
        z, carry = no_dyn_feed_forward_step(inp, carry, delay_idx, decay=decay)
        return carry, z

    state, zs = lax.scan(body, state, inputs)
    return zs, state


# ---------------------------------------------------------------------------
# Layout helpers (module layout <-> kernel layout), used only for validation.
# ---------------------------------------------------------------------------
def kernel_X_to_module(X3, B, C, H, W):
    M = X3.shape[0]
    return np.transpose(np.asarray(X3).reshape(M, B, C, H, W), (1, 2, 0, 3, 4))


def ring_to_deque(buf, ptr, B, C, H, W):
    T = buf.shape[0]
    b = np.asarray(buf)
    p = int(ptr)
    return np.stack([b[(p - a) % T] for a in range(T)], axis=0).reshape(T, B, C, H, W)


if __name__ == "__main__":
    # noDynParameters (synthetic, deterministic):
    #   m = 3 delay taps, delays = [0, 1, 2] ms, tau_s_inv = 200 /s
    dt = 1e-3
    delays_ms = [0.0, 1.0, 2.0]
    m = len(delays_ms)
    tau_s_inv = 200.0
    decay = float(1.0 - dt * tau_s_inv)          # forward-Euler trace decay

    # shape = (C, H, W); small, but lane-dense after flattening (H*W = 256)
    batch, C, H, W = 2, 4, 16, 16
    T = int(max(delays_ms) * 1e-3 / dt) + 1      # buffer length = 3
    delay_idx = jnp.asarray(
        [int(d * 1e-3 / dt) for d in delays_ms], dtype=jnp.int32)
    didx_np = np.asarray(delay_idx)

    n_steps = 5
    key = jax.random.PRNGKey(0)
    inputs = jax.random.normal(key, (n_steps, batch, C, H, W), dtype=jnp.float32)

    # kernel-layout state; DONATE it so ring buffer + trace update are in place
    state = init_state(batch, C, m, T, H, W, jnp.float32)
    run = jax.jit(functools.partial(no_dyn_feed_forward_run, decay=decay),
                  donate_argnums=(1,))
    zs, (X3, buf, ptr) = run(inputs, state, delay_idx)
    jax.block_until_ready((zs, X3, buf, ptr))

    # --- numpy reference: deque appendleft + per-tap gather + trace decay ------
    inputs_np = np.asarray(inputs)
    X_ref = np.zeros((batch, C, m, H, W), np.float32)
    buf_ref = np.zeros((T, batch, C, H, W), np.float32)
    for t in range(n_steps):
        buf_ref = np.concatenate([inputs_np[t][None], buf_ref[:-1]], axis=0)
        delayed = np.stack([buf_ref[k] for k in didx_np], axis=2)
        X_ref = decay * X_ref + delayed

    X_mod = kernel_X_to_module(X3, batch, C, H, W)
    buf_mod = ring_to_deque(buf, ptr, batch, C, H, W)

    assert np.allclose(np.asarray(zs), inputs_np)
    assert np.allclose(X_mod, X_ref, rtol=1e-5, atol=1e-6)
    assert np.allclose(buf_mod, buf_ref)

    # --- bf16 state path smoke test (dtype-aware tiling, ~2x less HBM traffic) --
    state_bf16 = init_state(batch, C, m, T, H, W, jnp.bfloat16)
    step = jax.jit(functools.partial(no_dyn_feed_forward_step, decay=decay),
                   donate_argnums=(1,))
    z_b, state_bf16 = step(inputs[0], state_bf16, delay_idx)
    jax.block_until_ready(state_bf16)
    assert np.isfinite(np.asarray(state_bf16[0], np.float32)).all()

    print("KERNEL_OK")
</pallas_src>

<mosaic_0001>
module attributes {stable_mosaic.version = 11 : i64} {
  func.func @_trace_kernel(%arg0: i32, %arg1: i32, %arg2: memref<3xi32, #tpu.memory_space<smem>>, %arg3: memref<1x8x256xf32, #tpu.memory_space<vmem>>, %arg4: memref<1x8x256xf32, #tpu.memory_space<vmem>>, %arg5: memref<1x8x256xf32, #tpu.memory_space<vmem>>) attributes {dimension_semantics = [#tpu.dimension_semantics<arbitrary>, #tpu.dimension_semantics<parallel>], iteration_bounds = array<i64: 3, 1>, scalar_prefetch = 1 : i64, scratch_operands = 0 : i64, tpu.core_type = #tpu.core_type<tc>, window_params = [{transform_indices = @transform_0, window_bounds = array<i64: 1, 8, 256>}, {transform_indices = @transform_1, window_bounds = array<i64: 1, 8, 256>}, {transform_indices = @transform_2, window_bounds = array<i64: 1, 8, 256>}]} {
    %c0 = arith.constant 0 : index
    %c0_0 = arith.constant 0 : index
    %c0_1 = arith.constant 0 : index
    %0 = vector.load %arg3[%c0, %c0_0, %c0_1] : memref<1x8x256xf32, #tpu.memory_space<vmem>>, vector<1x8x256xf32>
    %1 = vector.shape_cast %0 : vector<1x8x256xf32> to vector<8x256xf32>
    %cst = arith.constant 8.000000e-01 : f32
    %2 = vector.broadcast %cst : f32 to vector<8x256xf32>
    %3 = arith.mulf %2, %1 : vector<8x256xf32>
    %c0_2 = arith.constant 0 : index
    %c0_3 = arith.constant 0 : index
    %c0_4 = arith.constant 0 : index
    %4 = vector.load %arg4[%c0_2, %c0_3, %c0_4] : memref<1x8x256xf32, #tpu.memory_space<vmem>>, vector<1x8x256xf32>
    %5 = vector.shape_cast %4 : vector<1x8x256xf32> to vector<8x256xf32>
    %6 = arith.addf %3, %5 : vector<8x256xf32>
    %c0_5 = arith.constant 0 : index
    %c0_6 = arith.constant 0 : index
    %c0_7 = arith.constant 0 : index
    %7 = vector.load %arg5[%c0_5, %c0_6, %c0_7] : memref<1x8x256xf32, #tpu.memory_space<vmem>>, vector<1x8x256xf32>
    %8 = vector.shape_cast %7 : vector<1x8x256xf32> to vector<8x256xf32>
    %9 = vector.shape_cast %6 : vector<8x256xf32> to vector<1x8x256xf32>
    tpu.vector_store %arg5[%c0_5, %c0_6, %c0_7], %9 {strides = array<i32>} : memref<1x8x256xf32, #tpu.memory_space<vmem>>, vector<1x8x256xf32>,
    return
  }
  func.func @transform_0(%arg0: i32, %arg1: i32, %arg2: memref<3xi32, #tpu.memory_space<smem>>) -> (i32, i32, i32) {
    %c0_i32 = arith.constant 0 : i32
    %c0_i32_0 = arith.constant 0 : i32
    return %arg0, %arg1, %c0_i32 : i32, i32, i32
  }
  func.func @transform_1(%arg0: i32, %arg1: i32, %arg2: memref<3xi32, #tpu.memory_space<smem>>) -> (i32, i32, i32) {
    %0 = arith.index_cast %arg0 : i32 to index
    %1 = memref.load %arg2[%0] : memref<3xi32, #tpu.memory_space<smem>>
    %c0_i32 = arith.constant 0 : i32
    %c0_i32_0 = arith.constant 0 : i32
    return %1, %arg1, %c0_i32 : i32, i32, i32
  }
  func.func @transform_2(%arg0: i32, %arg1: i32, %arg2: memref<3xi32, #tpu.memory_space<smem>>) -> (i32, i32, i32) {
    %c0_i32 = arith.constant 0 : i32
    %c0_i32_0 = arith.constant 0 : i32
    return %arg0, %arg1, %c0_i32 : i32, i32, i32
  }
}

</mosaic_0001>

<bundles_post_ra>
// kernel: closed_call.10
= control target key start
LH: loop header
LB: loop body
LE: loop exit
PB: predicated region body
PF: predicated region fallthrough
CT: control target
= control target key end

     0   :  { %s487_s0 = inlined_call_operand.vmem [shape: s32[3], index: 0, kind: input, shape index: {}]   ;;  %s488_s1 = inlined_call_operand.vmem [shape: f32[3,8,256], index: 1, kind: input, shape index: {}, may-alias: {1,3}]   ;;  %s489_s2 = inlined_call_operand.vmem [shape: f32[3,8,256], index: 2, kind: input, shape index: {}]   ;;  %s490_s3 = inlined_call_operand.vmem [shape: f32[3,8,256], index: 3, kind: output, shape index: {}, may-alias: {1,3}]  }
   0x1   :  { %s8_s14 = sshll.u32 %s487_s0, 4  ;;  %s9_s14 = int_to_ptr.vmem [resolvable:$true] %s8_s14 }
   0x2   :  { %s392_s15 = scalar_lea.vmem %s9_s14, 16  ;;  %p397_p1 = scmp.lt.s32.totalorder %s9_s14, %s9_s14 }
   0x3   :  { %p393_p0 = scmp.ne.s32.totalorder %s9_s14, %s392_s15  ;;  %p398_p2 = scmp.lt.s32.totalorder %s392_s15, %s392_s15 }
   0x5   :  { %p399_p3 = por %p398_p2, %p397_p1 }
   0x7   :  { %p400_p4 = pnand %p399_p3, %p393_p0 }
   0x9   :  { %403 = shalt.err (!%p400_p4)  }
   0xa   :  { %s430_s16 = smov [#allocation3]  }
   0xb   :  { %11 = dma.vmem_to_smem %s9_s14, 16, %s430_s16, [#allocation2] }
   0xc   :  { %416 = dma.done.wait [#allocation2], 16 }
   0xd   :  { %417 = vsyncadd [#allocation2], 4294967280 }
   0xe   :  { %13 = sfence }
   0xf   :  { %s454_s17 = smov 0   ;;  %s456_s18 = smov 0  }
  0x10   :  { %s458_s19 = smov 0  }
  0x11 LB: > { %s31_s0 = sadd.s32 1, %s424_s18  ;;  %p355_p5 = scmp.ge.s32.totalorder %s428_s19, 1  ;;  %s428_s19 = sphi %s458_s19, %s19_s19   ;;  %s424_s18 = sphi %s456_s18, %s492_s18   ;;  %s420_s17 = sphi %s454_s17, %s491_s17  }
  0x12   : > { %p33_p6 = scmp.ge.s32.totalorder %s31_s0, 3  ;;  %p159_p7 = scmp.lt.s32.totalorder %s428_s19, 4 }
  0x14   : > { %s494_s0 = smov (%p33_p6, %s31_s0), 0  ;;  %p160_p8 = pnand %p355_p5, %p159_p7 }
  0x15   : > { %p199_p9 = scmp.lt.s32.totalorder (!%p160_p8), %s420_s17, 2  ;;  %s208_s20 = sld [smem:[#allocation3 + %s420_s17]] (!%p160_p8) }
  0x16   : > { %163 = sbr.rel (%p160_p8) target bundleno = 38 (0x26), region = 28 }
  0x1b   : > { %p209_p10 = scmp.lt.s32.totalorder (!%p160_p8), %s208_s20, 2 }
  0x1d   : > { %s496_s17 = smov (!%p199_p9, %s420_s17), 2  ;;  %s498_s20 = smov (!%p209_p10, %s208_s20), 2 }
  0x1e   : > { %s364_s21 = sshll.u32 %s496_s17, 4  ;;  %s365_s25 = sshll.u32 %s498_s20, 4 }
  0x1f   : > { %s207_s24 = scalar_lea.vmem %s488_s1, %s364_s21  ;;  %s217_s28 = scalar_lea.vmem %s489_s2, %s365_s25 }
  0x20   : > { %v228_v0 = vld [vmem:[%s207_s24] sm:$0xff]  ;;  %v229_v1 = vld [vmem:[%s207_s24 + $0x8] sm:$0xff]  ;;  %s227_s4 = scalar_lea.vmem %s490_s3, %s364_s21 }
  0x21   : > { %v230_v2 = vmul.f32 0.8, %v228_v0  ;;  %v231_v3 = vmul.f32 0.8, %v229_v1  ;;  %v232_v4 = vld [vmem:[%s217_s28] sm:$0xff]  ;;  %v233_v5 = vld [vmem:[%s217_s28 + $0x8] sm:$0xff] }
  0x23   : > { %v234_v6 = vadd.f32 %v232_v4, %v230_v2  ;;  %v235_v7 = vadd.f32 %v233_v5, %v231_v3 }
  0x25   : > { %236 = vst [vmem:[%s227_s4] sm:$0xff] %v234_v6  ;;  %237 = vst [vmem:[%s227_s4 + $0x8] sm:$0xff] %v235_v7 }
  0x26 PF: > { %s19_s19 = sadd.s32 1, %s428_s19   ;;  %s491_s17 = smov %s424_s18 }
  0x27   : > { %p16_p11 = scmp.ge.s32.totalorder %s19_s19, 5   ;;  %s492_s18 = smov %s494_s0 }
  0x29   :  { %18 = sbr.rel (!%p16_p11) target bundleno = 17 (0x11), region = 61 }

</bundles_post_ra>
